<compile_context>
chip_gen: v7x
topology: tpu7x:2x2x1
jax: 0.10.0
libtpu: 0.0.40
codegen_flags: <defaults>
</compile_context>

<pallas_src>
import jax
import jax.numpy as jnp
from jax.experimental import pallas as pl
from jax.experimental.pallas import tpu as pltpu

LANE = 128
MAX_BLOCK_ROWS = 1024  # (1024, 128) f32 block = 512 KiB; 2 inputs x 2 buffers = 2 MiB VMEM


def _dice_bce_kernel(x_ref, t_ref, acc_ref):
    """Accumulate per-slice partial sums of (p*t, p, t, bce) into acc_ref.

    x_ref, t_ref: (block_rows, LANE) tiles of logits / targets.
    acc_ref:      (1, 4, 8, LANE) f32 output block, resident across the inner grid axis.
    """
    c = pl.program_id(1)

    @pl.when(c == 0)
    def _():
        acc_ref[...] = jnp.zeros_like(acc_ref)

    x = x_ref[...].astype(jnp.float32)
    t = t_ref[...].astype(jnp.float32)

    # Numerically stable sigmoid + BCE sharing one exp.
    e = jnp.exp(-jnp.abs(x))            # exp(-|x|) in (0, 1]
    inv = 1.0 / (1.0 + e)
    p = jnp.where(x >= 0, inv, e * inv)  # sigmoid(x)
    # BCE from logits: max(x,0) - x*t + log(1 + exp(-|x|))
    bce = jnp.maximum(x, 0.0) - x * t + jnp.log(1.0 + e)

    def _partial(v):
        # Reduce (block_rows, LANE) -> (8, LANE) with pure VPU vreg adds.
        return v.reshape(-1, 8, LANE).sum(axis=0)

    acc_ref[0, 0] += _partial(p * t)   # intersection
    acc_ref[0, 1] += _partial(p)       # sum(sigmoid(outputs))
    acc_ref[0, 2] += _partial(t)       # sum(targets)
    acc_ref[0, 3] += _partial(bce)     # sum of per-element BCE


def dice_bce_loss(outputs, targets, smooth=1.0):
    """JAX/Pallas equivalent of DiceBCELoss.forward(outputs, targets, smooth)."""
    n = int(outputs.size)
    x = jnp.reshape(outputs, (-1,))
    t = jnp.reshape(targets, (-1,))

    rows = pl.cdiv(n, LANE)
    block_rows = min(MAX_BLOCK_ROWS, pl.cdiv(rows, 8) * 8)
    num_blocks = pl.cdiv(rows, block_rows)
    num_slices = 2 if num_blocks >= 2 else 1            # 2 TCs on v7x; harmless elsewhere
    num_blocks = pl.cdiv(num_blocks, num_slices) * num_slices
    padded_rows = num_blocks * block_rows

    pad = padded_rows * LANE - n
    if pad:
        # logit pad -1e9 -> sigmoid(pad) == 0.0 exactly in f32 and
        # bce(pad, 0) == log(1 + exp(-1e9)) == 0.0, so padding contributes nothing.
        x = jnp.pad(x, (0, pad), constant_values=-1e9)
        t = jnp.pad(t, (0, pad), constant_values=0)

    x2 = x.reshape(padded_rows, LANE)
    t2 = t.reshape(padded_rows, LANE)

    blocks_per_slice = num_blocks // num_slices
    grid = (num_slices, blocks_per_slice)

    in_spec = pl.BlockSpec(
        (block_rows, LANE),
        lambda s, c: (s * blocks_per_slice + c, 0),
    )
    out_spec = pl.BlockSpec((1, 4, 8, LANE), lambda s, c: (s, 0, 0, 0))

    partials = pl.pallas_call(
        _dice_bce_kernel,
        out_shape=jax.ShapeDtypeStruct((num_slices, 4, 8, LANE), jnp.float32),
        grid_spec=pltpu.PrefetchScalarGridSpec(
            num_scalar_prefetch=0,
            grid=grid,
            in_specs=[in_spec, in_spec],
            out_specs=out_spec,
        ),
        compiler_params=pltpu.CompilerParams(
            dimension_semantics=("parallel", "arbitrary"),
        ),
    )(x2, t2)

    sums = jnp.sum(partials, axis=(0, 2, 3))  # (4,) = [inter, sum_p, sum_t, sum_bce]
    inter, sum_p, sum_t, sum_bce = sums[0], sums[1], sums[2], sums[3]

    smooth = jnp.float32(smooth)
    dice_loss = 1.0 - (2.0 * inter + smooth) / (sum_p + sum_t + smooth)
    bce_mean = sum_bce / jnp.float32(n)
    return bce_mean + dice_loss


def _reference(outputs, targets, smooth=1.0):
    """Pure-JAX reference mirroring the PyTorch forward."""
    p = jax.nn.sigmoid(outputs).reshape(-1).astype(jnp.float32)
    t = targets.reshape(-1).astype(jnp.float32)
    inter = jnp.sum(p * t)
    dice_loss = 1.0 - (2.0 * inter + smooth) / (jnp.sum(p) + jnp.sum(t) + smooth)
    bce = -jnp.mean(t * jnp.log(p) + (1.0 - t) * jnp.log(1.0 - p))
    return bce + dice_loss


if __name__ == "__main__":
    key = jax.random.PRNGKey(0)
    k1, k2 = jax.random.split(key)

    # Segmentation-style shapes: (B, C, H, W) = (2, 4, 16, 16)
    outputs = jax.random.normal(k1, (2, 4, 16, 16), dtype=jnp.float32)  # logits
    targets = (jax.random.uniform(k2, (2, 4, 16, 16)) > 0.5).astype(jnp.float32)

    loss = jax.block_until_ready(dice_bce_loss(outputs, targets, smooth=1.0))
    ref = jax.block_until_ready(_reference(outputs, targets, smooth=1.0))

    assert jnp.isfinite(loss), "loss is not finite"
    assert jnp.abs(loss - ref) < 1e-4 + 1e-4 * jnp.abs(ref), (
        f"mismatch: kernel={loss} ref={ref}"
    )
    print("KERNEL_OK")
</pallas_src>

<mosaic_0001>
module attributes {stable_mosaic.version = 11 : i64} {
  func.func @_dice_bce_kernel(%arg0: i32, %arg1: i32, %arg2: memref<16x128xf32, #tpu.memory_space<vmem>>, %arg3: memref<16x128xf32, #tpu.memory_space<vmem>>, %arg4: memref<1x4x8x128xf32, #tpu.memory_space<vmem>>) attributes {dimension_semantics = [#tpu.dimension_semantics<parallel>, #tpu.dimension_semantics<arbitrary>], iteration_bounds = array<i64: 1, 1>, scalar_prefetch = 0 : i64, scratch_operands = 0 : i64, tpu.core_type = #tpu.core_type<tc>, window_params = [{transform_indices = @transform_0, window_bounds = array<i64: 16, 128>}, {transform_indices = @transform_1, window_bounds = array<i64: 16, 128>}, {transform_indices = @transform_2, window_bounds = array<i64: 1, 4, 8, 128>}]} {
    %c0_i32 = arith.constant 0 : i32
    %0 = arith.cmpi eq, %arg1, %c0_i32 : i32
    %1 = arith.extui %0 : i1 to i32
    %c0_i32_0 = arith.constant 0 : i32
    %2 = arith.cmpi ne, %1, %c0_i32_0 : i32
    scf.if %2 {
      %cst_42 = arith.constant 0.000000e+00 : f32
      %58 = vector.broadcast %cst_42 : f32 to vector<1x4x8x128xf32>
      %c0_43 = arith.constant 0 : index
      %c0_44 = arith.constant 0 : index
      %c0_45 = arith.constant 0 : index
      %c0_46 = arith.constant 0 : index
      %59 = vector.load %arg4[%c0_43, %c0_44, %c0_45, %c0_46] : memref<1x4x8x128xf32, #tpu.memory_space<vmem>>, vector<1x4x8x128xf32>
      tpu.vector_store %arg4[%c0_43, %c0_44, %c0_45, %c0_46], %58 {strides = array<i32>} : memref<1x4x8x128xf32, #tpu.memory_space<vmem>>, vector<1x4x8x128xf32>,
    } else {
    }
    %c0 = arith.constant 0 : index
    %c0_1 = arith.constant 0 : index
    %3 = vector.load %arg2[%c0, %c0_1] : memref<16x128xf32, #tpu.memory_space<vmem>>, vector<16x128xf32>
    %c0_2 = arith.constant 0 : index
    %c0_3 = arith.constant 0 : index
    %4 = vector.load %arg3[%c0_2, %c0_3] : memref<16x128xf32, #tpu.memory_space<vmem>>, vector<16x128xf32>
    %5 = math.absf %3 : vector<16x128xf32>
    %cst = arith.constant 0.000000e+00 : f32
    %6 = vector.broadcast %cst : f32 to vector<16x128xf32>
    %7 = arith.subf %6, %5 : vector<16x128xf32>
    %8 = math.exp %7 : vector<16x128xf32>
    %cst_4 = arith.constant 1.000000e+00 : f32
    %9 = vector.broadcast %cst_4 : f32 to vector<16x128xf32>
    %10 = arith.addf %9, %8 : vector<16x128xf32>
    %cst_5 = arith.constant 1.000000e+00 : f32
    %11 = vector.broadcast %cst_5 : f32 to vector<16x128xf32>
    %12 = arith.divf %11, %10 : vector<16x128xf32>
    %cst_6 = arith.constant 0.000000e+00 : f32
    %13 = vector.broadcast %cst_6 : f32 to vector<16x128xf32>
    %14 = arith.cmpf oge, %3, %13 : vector<16x128xf32>
    %15 = arith.mulf %8, %12 : vector<16x128xf32>
    %16 = arith.select %14, %12, %15 : vector<16x128xi1>, vector<16x128xf32>
    %cst_7 = arith.constant 0.000000e+00 : f32
    %17 = vector.broadcast %cst_7 : f32 to vector<16x128xf32>
    %18 = arith.maximumf %3, %17 : vector<16x128xf32>
    %19 = arith.mulf %3, %4 : vector<16x128xf32>
    %20 = arith.subf %18, %19 : vector<16x128xf32>
    %cst_8 = arith.constant 1.000000e+00 : f32
    %21 = vector.broadcast %cst_8 : f32 to vector<16x128xf32>
    %22 = arith.addf %21, %8 : vector<16x128xf32>
    %23 = math.log %22 : vector<16x128xf32>
    %24 = arith.addf %20, %23 : vector<16x128xf32>
    %c0_9 = arith.constant 0 : index
    %c0_10 = arith.constant 0 : index
    %c0_11 = arith.constant 0 : index
    %c0_12 = arith.constant 0 : index
    %25 = vector.load %arg4[%c0_9, %c0_10, %c0_11, %c0_12] : memref<1x4x8x128xf32, #tpu.memory_space<vmem>>, vector<1x1x8x128xf32>
    %26 = vector.shape_cast %25 : vector<1x1x8x128xf32> to vector<8x128xf32>
    %27 = arith.mulf %16, %4 : vector<16x128xf32>
    %28 = vector.shape_cast %27 : vector<16x128xf32> to vector<2x8x128xf32>
    %cst_13 = arith.constant dense<0.000000e+00> : vector<8x128xf32>
    %29 = vector.multi_reduction <add>, %28, %cst_13 [0] : vector<2x8x128xf32> to vector<8x128xf32>
    %30 = arith.addf %26, %29 : vector<8x128xf32>
    %c0_14 = arith.constant 0 : index
    %c0_15 = arith.constant 0 : index
    %c0_16 = arith.constant 0 : index
    %c0_17 = arith.constant 0 : index
    %31 = vector.load %arg4[%c0_14, %c0_15, %c0_16, %c0_17] : memref<1x4x8x128xf32, #tpu.memory_space<vmem>>, vector<1x1x8x128xf32>
    %32 = vector.shape_cast %31 : vector<1x1x8x128xf32> to vector<8x128xf32>
    %33 = vector.shape_cast %30 : vector<8x128xf32> to vector<1x1x8x128xf32>
    tpu.vector_store %arg4[%c0_14, %c0_15, %c0_16, %c0_17], %33 {strides = array<i32>} : memref<1x4x8x128xf32, #tpu.memory_space<vmem>>, vector<1x1x8x128xf32>,
    %c0_18 = arith.constant 0 : index
    %c1 = arith.constant 1 : index
    %c0_19 = arith.constant 0 : index
    %c0_20 = arith.constant 0 : index
    %34 = vector.load %arg4[%c0_18, %c1, %c0_19, %c0_20] : memref<1x4x8x128xf32, #tpu.memory_space<vmem>>, vector<1x1x8x128xf32>
    %35 = vector.shape_cast %34 : vector<1x1x8x128xf32> to vector<8x128xf32>
    %36 = vector.shape_cast %16 : vector<16x128xf32> to vector<2x8x128xf32>
    %cst_21 = arith.constant dense<0.000000e+00> : vector<8x128xf32>
    %37 = vector.multi_reduction <add>, %36, %cst_21 [0] : vector<2x8x128xf32> to vector<8x128xf32>
    %38 = arith.addf %35, %37 : vector<8x128xf32>
    %c0_22 = arith.constant 0 : index
    %c1_23 = arith.constant 1 : index
    %c0_24 = arith.constant 0 : index
    %c0_25 = arith.constant 0 : index
    %39 = vector.load %arg4[%c0_22, %c1_23, %c0_24, %c0_25] : memref<1x4x8x128xf32, #tpu.memory_space<vmem>>, vector<1x1x8x128xf32>
    %40 = vector.shape_cast %39 : vector<1x1x8x128xf32> to vector<8x128xf32>
    %41 = vector.shape_cast %38 : vector<8x128xf32> to vector<1x1x8x128xf32>
    tpu.vector_store %arg4[%c0_22, %c1_23, %c0_24, %c0_25], %41 {strides = array<i32>} : memref<1x4x8x128xf32, #tpu.memory_space<vmem>>, vector<1x1x8x128xf32>,
    %c0_26 = arith.constant 0 : index
    %c2 = arith.constant 2 : index
    %c0_27 = arith.constant 0 : index
    %c0_28 = arith.constant 0 : index
    %42 = vector.load %arg4[%c0_26, %c2, %c0_27, %c0_28] : memref<1x4x8x128xf32, #tpu.memory_space<vmem>>, vector<1x1x8x128xf32>
    %43 = vector.shape_cast %42 : vector<1x1x8x128xf32> to vector<8x128xf32>
    %44 = vector.shape_cast %4 : vector<16x128xf32> to vector<2x8x128xf32>
    %cst_29 = arith.constant dense<0.000000e+00> : vector<8x128xf32>
    %45 = vector.multi_reduction <add>, %44, %cst_29 [0] : vector<2x8x128xf32> to vector<8x128xf32>
    %46 = arith.addf %43, %45 : vector<8x128xf32>
    %c0_30 = arith.constant 0 : index
    %c2_31 = arith.constant 2 : index
    %c0_32 = arith.constant 0 : index
    %c0_33 = arith.constant 0 : index
    %47 = vector.load %arg4[%c0_30, %c2_31, %c0_32, %c0_33] : memref<1x4x8x128xf32, #tpu.memory_space<vmem>>, vector<1x1x8x128xf32>
    %48 = vector.shape_cast %47 : vector<1x1x8x128xf32> to vector<8x128xf32>
    %49 = vector.shape_cast %46 : vector<8x128xf32> to vector<1x1x8x128xf32>
    tpu.vector_store %arg4[%c0_30, %c2_31, %c0_32, %c0_33], %49 {strides = array<i32>} : memref<1x4x8x128xf32, #tpu.memory_space<vmem>>, vector<1x1x8x128xf32>,
    %c0_34 = arith.constant 0 : index
    %c3 = arith.constant 3 : index
    %c0_35 = arith.constant 0 : index
    %c0_36 = arith.constant 0 : index
    %50 = vector.load %arg4[%c0_34, %c3, %c0_35, %c0_36] : memref<1x4x8x128xf32, #tpu.memory_space<vmem>>, vector<1x1x8x128xf32>
    %51 = vector.shape_cast %50 : vector<1x1x8x128xf32> to vector<8x128xf32>
    %52 = vector.shape_cast %24 : vector<16x128xf32> to vector<2x8x128xf32>
    %cst_37 = arith.constant dense<0.000000e+00> : vector<8x128xf32>
    %53 = vector.multi_reduction <add>, %52, %cst_37 [0] : vector<2x8x128xf32> to vector<8x128xf32>
    %54 = arith.addf %51, %53 : vector<8x128xf32>
    %c0_38 = arith.constant 0 : index
    %c3_39 = arith.constant 3 : index
    %c0_40 = arith.constant 0 : index
    %c0_41 = arith.constant 0 : index
    %55 = vector.load %arg4[%c0_38, %c3_39, %c0_40, %c0_41] : memref<1x4x8x128xf32, #tpu.memory_space<vmem>>, vector<1x1x8x128xf32>
    %56 = vector.shape_cast %55 : vector<1x1x8x128xf32> to vector<8x128xf32>
    %57 = vector.shape_cast %54 : vector<8x128xf32> to vector<1x1x8x128xf32>
    tpu.vector_store %arg4[%c0_38, %c3_39, %c0_40, %c0_41], %57 {strides = array<i32>} : memref<1x4x8x128xf32, #tpu.memory_space<vmem>>, vector<1x1x8x128xf32>,
    return
  }
  func.func @transform_0(%arg0: i32, %arg1: i32) -> (i32, i32) {
    %c1_i32 = arith.constant 1 : i32
    %0 = arith.muli %arg0, %c1_i32 : i32
    %1 = arith.addi %0, %arg1 : i32
    %c0_i32 = arith.constant 0 : i32
    %c0_i32_0 = arith.constant 0 : i32
    return %1, %c0_i32 : i32, i32
  }
  func.func @transform_1(%arg0: i32, %arg1: i32) -> (i32, i32) {
    %c1_i32 = arith.constant 1 : i32
    %0 = arith.muli %arg0, %c1_i32 : i32
    %1 = arith.addi %0, %arg1 : i32
    %c0_i32 = arith.constant 0 : i32
    %c0_i32_0 = arith.constant 0 : i32
    return %1, %c0_i32 : i32, i32
  }
  func.func @transform_2(%arg0: i32, %arg1: i32) -> (i32, i32, i32, i32) {
    %c0_i32 = arith.constant 0 : i32
    %c0_i32_0 = arith.constant 0 : i32
    %c0_i32_1 = arith.constant 0 : i32
    %c0_i32_2 = arith.constant 0 : i32
    return %arg0, %c0_i32, %c0_i32_0, %c0_i32_1 : i32, i32, i32, i32
  }
}

</mosaic_0001>

<bundles_post_ra>
// kernel: tpu_custom_call.1
= control target key start
LH: loop header
LB: loop body
LE: loop exit
PB: predicated region body
PF: predicated region fallthrough
CT: control target
= control target key end

     0   :  { %7 = vsyncpa [#allocation3], 0  ;;  %s290_s0 = inlined_call_operand.hbm [shape: f32[16,128], index: 0, kind: input, shape index: {}]   ;;  %s291_s1 = inlined_call_operand.hbm [shape: f32[16,128], index: 1, kind: input, shape index: {}]   ;;  %s292_s2 = inlined_call_operand.hbm [shape: f32[1,4,8,128], index: 2, kind: output, shape index: {}]  }
   0x1   :  { %8 = vsyncpa [#allocation6], 0 }
   0x2   :  { %9 = vsyncpa [#allocation4], 0  ;;  %s225_s9 = smov [#allocation2]   ;;  %s153_s13 = scalar_lea.hbm %s290_s0, 256 }
   0x3   :  { %s19_s10 = sshll.u32 %s225_s9, 4  ;;  %p154_p0 = scmp.ne.s32.totalorder %s290_s0, %s153_s13  ;;  %s20_s10 = int_to_ptr.vmem [resolvable:$true] %s19_s10 }
   0x4   :  { %p157_p1 = scmp.lt.u32.totalorder %s153_s13, %s290_s0 }
   0x6   :  { %p159_p2 = pnand %p157_p1, %p154_p0 }
   0x8   :  { %162 = shalt.err (!%p159_p2)
}
   0x9   :  { %s163_s18 = scalar_lea.vmem %s20_s10, 256  ;;  %p168_p4 = scmp.lt.s32.totalorder %s20_s10, %s20_s10 }
   0xa   :  { %p164_p3 = scmp.ne.s32.totalorder %s20_s10, %s163_s18  ;;  %p169_p5 = scmp.lt.s32.totalorder %s163_s18, %s163_s18 }
   0xc   :  { %p170_p6 = por %p169_p5, %p168_p4 }
   0xe   :  { %p171_p7 = pnand %p170_p6, %p164_p3 }
  0x10   :  { %174 = shalt.err (!%p171_p7)
}
  0x11   :  { %s226_s19 = smov 128   ;;  %s227_s20 = smov 8  }
  0x12   :  { %25 = dma.hbm_to_vmem [thread:$0]  %s290_s0, 256, %s20_s10, [#allocation3], %s226_s19, %s226_s19, %s227_s20  }
  0x13   :  { %s228_s23 = smov [#allocation5]   ;;  %s175_s27 = scalar_lea.hbm %s291_s1, 256 }
  0x14   :  { %s35_s24 = sshll.u32 %s228_s23, 4  ;;  %p176_p8 = scmp.ne.s32.totalorder %s291_s1, %s175_s27  ;;  %s36_s24 = int_to_ptr.vmem [resolvable:$true] %s35_s24 }
  0x15   :  { %p179_p9 = scmp.lt.u32.totalorder %s175_s27, %s291_s1 }
  0x17   :  { %p181_p10 = pnand %p179_p9, %p176_p8 }
  0x19   :  { %184 = shalt.err (!%p181_p10)
}
  0x1a   :  { %s185_s4 = scalar_lea.vmem %s36_s24, 256  ;;  %p190_p12 = scmp.lt.s32.totalorder %s36_s24, %s36_s24 }
  0x1b   :  { %p186_p11 = scmp.ne.s32.totalorder %s36_s24, %s185_s4  ;;  %p191_p13 = scmp.lt.s32.totalorder %s185_s4, %s185_s4 }
  0x1d   :  { %p192_p0 = por %p191_p13, %p190_p12 }
  0x1f   :  { %p193_p1 = pnand %p192_p0, %p186_p11 }
  0x21   :  { %196 = shalt.err (!%p193_p1)
}
  0x22   :  { %41 = dma.hbm_to_vmem [thread:$0]  %s291_s1, 256, %s36_s24, [#allocation6], %s226_s19, %s226_s19, %s227_s20  }
  0x23   :  { %219 = dma.done.wait [#allocation3], 256  }
  0x24   :  { %220 = vsyncadd [#allocation3], 4294967040 }
  0x25   :  { %221 = dma.done.wait [#allocation6], 256  }
  0x26   :  { %222 = vsyncadd [#allocation6], 4294967040  ;;  %v60_v0 = vld [vmem:[#allocation2] sm:$0xff]  ;;  %v61_v1 = vld [vmem:[#allocation2 + $0x8] sm:$0xff]  ;;  %s229_s1 = smov [#allocation7]  }
  0x27   :  { %v62_v2 = vld [vmem:[#allocation5] sm:$0xff]  ;;  %v63_v3 = vld [vmem:[#allocation5 + $0x8] sm:$0xff]  ;;  %v64_v4 = vand.u32 2147483647, %v60_v0  ;;  %v65_v5 = vand.u32 2147483647, %v61_v1 }
  0x28   :  { %v109_v6 = vadd.f32 %v63_v3, %v62_v2  ;;  %v84_v15 = vmax.f32 %v60_v0, 0.0  ;;  %v86_v16 = vmul.f32 %v62_v2, %v60_v0  ;;  %v85_v17 = vmax.f32 %v61_v1, 0.0  ;;  %s122_s6 = sshll.u32 %s229_s1, 4  ;;  %s123_s6 = int_to_ptr.vmem [resolvable:$true] %s122_s6 }
  0x29   :  { %v66_v7 = vsub.f32 0.0, %v64_v4  ;;  %v67_v8 = vsub.f32 0.0, %v65_v5  ;;  %v87_v18 = vmul.f32 %v63_v3, %v61_v1  ;;  %vm78_vm0 = vcmp.ge.f32.partialorder %v60_v0, 0.0  ;;  %s197_s7 = scalar_lea.vmem %s123_s6, 512  ;;  %p202_p3 = scmp.lt.s32.totalorder %s123_s6, %s123_s6 }
  0x2a   :  { %111 = vst [vmem:[#allocation7 + $0x10] sm:$0xff] %v109_v6  ;;  %vm79_vm1 = vcmp.ge.f32.partialorder %v61_v1, 0.0  ;;  %v88_v22 = vsub.f32 %v84_v15, %v86_v16  ;;  %p198_p2 = scmp.ne.s32.totalorder %s123_s6, %s197_s7  ;;  %p203_p4 = scmp.lt.s32.totalorder %s197_s7, %s197_s7 }
  0x2b   :  { %v68_v9 = vmul.f32 1.442695, %v66_v7  ;;  %v70_v10 = vmul.f32 1.442695, %v67_v8  ;;  %v89_v25 = vsub.f32 %v85_v17, %v87_v18 }
  0x2c   :  { %p204_p5 = por %p203_p4, %p202_p3 }
  0x2d   :  { %141 = vpow2.f32 %v68_v9 }
  0x2e   :  { %143 = vpow2.f32 %v70_v10  ;;  %p205_p6 = pnand %p204_p5, %p198_p2 }
  0x37   :  { %v142_v11 = vpop.eup %141 }
  0x38   :  { %v144_v12 = vpop.eup %143  ;;  %v72_v13 = vadd.f32 1.0, %v142_v11 }
  0x39   :  { %v73_v14 = vadd.f32 1.0, %v144_v12 }
  0x3a   :  { %145 = vrcp.f32 %v72_v13 }
  0x3b   :  { %147 = vrcp.f32 %v73_v14 }
  0x3c   :  { %149 = vlog2.f32 %v72_v13 }
  0x3d   :  { %151 = vlog2.f32 %v73_v14 }
  0x44   :  { %v146_v19 = vpop.eup %145 }
  0x45   :  { %v148_v20 = vpop.eup %147  ;;  %v80_v21 = vmul.f32 %v146_v19, %v142_v11 }
  0x46   :  { %v150_v23 = vpop.eup %149  ;;  %v81_v24 = vmul.f32 %v148_v20, %v144_v12 }
  0x47   :  { %v152_v26 = vpop.eup %151  ;;  %v82_v27 = vsel %vm78_vm0, %v146_v19, %v80_v21  ;;  %v91_v28 = vmul.f32 0.6931472, %v150_v23 }
  0x48   :  { %v83_v29 = vsel %vm79_vm1, %v148_v20, %v81_v24  ;;  %v97_v30 = vmul.f32 %v82_v27, %v62_v2  ;;  %v93_v31 = vmul.f32 0.6931472, %v152_v26 }
  0x49   :  { %v98_v32 = vmul.f32 %v83_v29, %v63_v3  ;;  %v104_v33 = vadd.f32 %v83_v29, %v82_v27  ;;  %v94_v34 = vadd.f32 %v91_v28, %v88_v22 }
  0x4a   :  { %v95_v35 = vadd.f32 %v93_v31, %v89_v25 }
  0x4b   :  { %v99_v36 = vadd.f32 %v98_v32, %v97_v30  ;;  %106 = vst [vmem:[#allocation7 + $0x8] sm:$0xff] %v104_v33 }
  0x4c   :  { %v114_v37 = vadd.f32 %v95_v35, %v94_v34 }
  0x4d   :  { %101 = vst [vmem:[#allocation7] sm:$0xff] %v99_v36 }
  0x4e   :  { %116 = vst [vmem:[#allocation7 + $0x18] sm:$0xff] %v114_v37 }
  0x4f   :  { %208 = shalt.err (!%p205_p6)
}
  0x50   :  { %s209_s10 = scalar_lea.hbm %s292_s2, 512 }
  0x51   :  { %p210_p7 = scmp.ne.s32.totalorder %s292_s2, %s209_s10  ;;  %p213_p8 = scmp.lt.u32.totalorder %s209_s10, %s292_s2 }
  0x53   :  { %p215_p9 = pnand %p213_p8, %p210_p7 }
  0x55   :  { %218 = shalt.err (!%p215_p9)
}
  0x56   :  { %128 = dma.vmem_to_hbm [thread:$0]  %s123_s6, 512, %s292_s2, [#allocation4], %s226_s19, %s226_s19, %s227_s20  }
  0x57   :  { %223 = dma.done.wait [#allocation4], 512  }
  0x58   :  { %224 = vsyncadd [#allocation4], 4294966784 }
  0x59   :  { %132 = vsyncpa [#allocation3], 1 }
  0x5a   :  { %133 = vsyncpa [#allocation6], 1 }
  0x5b   :  { %134 = vsyncpa [#allocation4], 1 }

</bundles_post_ra>
